<compile_context>
chip_gen: v5e
topology: v5e:2x2
jax: 0.10.0
libtpu: 0.0.40
codegen_flags: <defaults>
</compile_context>

<pallas_src>
import numpy as np
import jax
import jax.numpy as jnp
from jax.experimental import pallas as pl
from jax.experimental.pallas import tpu as pltpu

# ---- problem sizes (small, consistent with the module) -------------------------
INPUT_DIM = 32
HIDDEN = 128
ACTION_DIM = 3
N_COMP = 10
TIME_DIM = 1
HEAD_DIM = N_COMP * (2 * ACTION_DIM + 1)   # 70 (means | covariances | logits)
N_RES = 4

GROUP = 16                                  # lanes per group in the permuted head
HEAD_PERM = GROUP * (ACTION_DIM + 1)        # 64: 3 mean groups + 1 logit group
OUT_W = 8                                   # output block width (3 actions + pad)
TM_MAX = 512                                # max rows per grid step
NEG_INF = -1e9                              # bias for unused logit lanes


def _round_up(a, b):
    return ((a + b - 1) // b) * b


def gmm_forward_kernel(x_ref, w_in_ref, b_in_ref,
                       w1_ref, b1_ref, w2_ref, b2_ref,
                       wh_ref, bh_ref, out_ref):
    x = x_ref[...]                                                # (TM, INPUT_DIM) bf16
    tm = x.shape[0]

    # input layer: Linear + ReLU (bf16 matmul, f32 accumulate / elementwise)
    h = jnp.maximum(
        jnp.dot(x, w_in_ref[...], preferred_element_type=jnp.float32)
        + b_in_ref[...], 0.0)                                     # (TM, HIDDEN) f32

    # 4 residual blocks: h = Linear(ReLU(Linear(h))) + h
    for r in range(N_RES):
        res = h
        t = jnp.maximum(
            jnp.dot(h.astype(jnp.bfloat16), w1_ref[r],
                    preferred_element_type=jnp.float32)
            + b1_ref[r:r + 1, :], 0.0)
        h = (jnp.dot(t.astype(jnp.bfloat16), w2_ref[r],
                     preferred_element_type=jnp.float32)
             + b2_ref[r:r + 1, :] + res)

    # permuted head: [mean_d0 | mean_d1 | mean_d2 | logits], 16 lanes per group
    params = (jnp.dot(h.astype(jnp.bfloat16), wh_ref[...],
                      preferred_element_type=jnp.float32)
              + bh_ref[...])                                      # (TM, HEAD_PERM) f32

    # mixture-weight logits; argmax(softmax) == argmax(logits). Padded lanes in
    # this group carry a -1e9 bias so they can never win the argmax.
    logits = params[:, ACTION_DIM * GROUP:(ACTION_DIM + 1) * GROUP]  # (TM, 16)
    ids = jax.lax.broadcasted_iota(jnp.int32, logits.shape, 1)
    lmax = jnp.max(logits, axis=-1, keepdims=True)
    # first index achieving the max (matches torch.argmax tie-breaking)
    idx = jnp.min(jnp.where(logits == lmax, ids, GROUP), axis=-1, keepdims=True)
    mask = ids == idx                                             # (TM, 16)

    def pick(d):
        grp = params[:, d * GROUP:(d + 1) * GROUP]                # (TM, 16)
        return jnp.sum(jnp.where(mask, grp, 0.0), axis=-1, keepdims=True)

    # tanh squash and per-dimension scale [6, 6, pi] (scalars -> no captured consts)
    a0 = jnp.tanh(pick(0)) * 6.0
    a1 = jnp.tanh(pick(1)) * 6.0
    a2 = jnp.tanh(pick(2)) * float(np.pi)
    pad = jnp.zeros((tm, OUT_W - ACTION_DIM), jnp.float32)
    out_ref[...] = jnp.concatenate([a0, a1, a2, pad], axis=-1)    # (TM, OUT_W)


def _permute_head(wh, bh):
    """Permute head columns to dim-major 16-lane groups; drop covariance cols."""
    wm = wh[:, :N_COMP * ACTION_DIM].reshape(HIDDEN, N_COMP, ACTION_DIM)
    wlog = wh[:, -N_COMP:]
    wpad = jnp.zeros((HIDDEN, GROUP - N_COMP), wh.dtype)

    bm = bh[:, :N_COMP * ACTION_DIM].reshape(1, N_COMP, ACTION_DIM)
    blog = bh[:, -N_COMP:]
    bzero = jnp.zeros((1, GROUP - N_COMP), bh.dtype)
    bneg = jnp.full((1, GROUP - N_COMP), NEG_INF, bh.dtype)

    w_groups, b_groups = [], []
    for d in range(ACTION_DIM):
        w_groups += [wm[:, :, d], wpad]
        b_groups += [bm[:, :, d], bzero]
    w_groups += [wlog, wpad]
    b_groups += [blog, bneg]
    return jnp.concatenate(w_groups, axis=1), jnp.concatenate(b_groups, axis=1)


def gmm_forward(x, p, deterministic=True):
    """x: (B, INPUT_DIM) float (time_dim=1). Returns deterministic actions (B, ACTION_DIM)."""
    assert deterministic, "only the deterministic branch is implemented (see TODO)"
    B = x.shape[0]
    N = B * TIME_DIM
    x2 = x.reshape(N, INPUT_DIM).astype(jnp.bfloat16)

    # bf16 weights for the MXU; biases stay f32; head permuted/padded to 64 lanes.
    w_in = p["w_in"].astype(jnp.bfloat16)
    w1 = p["w1"].astype(jnp.bfloat16)
    w2 = p["w2"].astype(jnp.bfloat16)
    b_in = p["b_in"].astype(jnp.float32)
    b1 = p["b1"].astype(jnp.float32)
    b2 = p["b2"].astype(jnp.float32)
    wh_p, bh_p = _permute_head(p["wh"].astype(jnp.float32), p["bh"].astype(jnp.float32))
    wh_p = wh_p.astype(jnp.bfloat16)
    bh_p = bh_p.astype(jnp.float32)

    # batch tile: aim for >= 2 grid steps (v7x has 2 TensorCores), >= 16 rows
    # (one packed bf16 sublane group), capped at TM_MAX; pad rows to a multiple.
    tm = min(TM_MAX, _round_up(max((N + 1) // 2, 1), 16))
    n_pad = _round_up(N, tm)
    if n_pad != N:
        x2 = jnp.pad(x2, ((0, n_pad - N), (0, 0)))
    grid = (n_pad // tm,)

    weight_bytes = ((w_in.size + w1.size + w2.size + wh_p.size) * 2
                    + (b_in.size + b1.size + b2.size + bh_p.size) * 4)
    cost = pl.CostEstimate(
        flops=2 * n_pad * (INPUT_DIM * HIDDEN
                           + 2 * N_RES * HIDDEN * HIDDEN
                           + HIDDEN * HEAD_PERM),
        transcendentals=n_pad * ACTION_DIM,
        bytes_accessed=x2.size * 2 + n_pad * OUT_W * 4 + weight_bytes)

    def const_spec(shape):
        nd = len(shape)
        return pl.BlockSpec(shape, lambda i, _nd=nd: (0,) * _nd)

    out = pl.pallas_call(
        gmm_forward_kernel,
        out_shape=jax.ShapeDtypeStruct((n_pad, OUT_W), jnp.float32),
        grid=grid,
        in_specs=[
            pl.BlockSpec((tm, INPUT_DIM), lambda i: (i, 0)),
            const_spec((INPUT_DIM, HIDDEN)),
            const_spec((1, HIDDEN)),
            const_spec((N_RES, HIDDEN, HIDDEN)),
            const_spec((N_RES, HIDDEN)),
            const_spec((N_RES, HIDDEN, HIDDEN)),
            const_spec((N_RES, HIDDEN)),
            const_spec((HIDDEN, HEAD_PERM)),
            const_spec((1, HEAD_PERM)),
        ],
        out_specs=pl.BlockSpec((tm, OUT_W), lambda i: (i, 0)),
        compiler_params=pltpu.CompilerParams(
            dimension_semantics=("parallel",)),
        cost_estimate=cost,
    )(x2, w_in, b_in, w1, b1, w2, b2, wh_p, bh_p)

    actions = out[:N, :ACTION_DIM]
    # network_type != 'WayformerEncoder', time_dim == 1 -> (B, ACTION_DIM)
    return actions.reshape(B, ACTION_DIM)


def init_params(key):
    ks = jax.random.split(key, 8)

    def lin(k, fan_in, shape):
        bound = 1.0 / np.sqrt(fan_in)
        return jax.random.uniform(k, shape, jnp.float32, -bound, bound)

    return {
        "w_in": lin(ks[0], INPUT_DIM, (INPUT_DIM, HIDDEN)),
        "b_in": lin(ks[1], INPUT_DIM, (1, HIDDEN)),
        "w1":   lin(ks[2], HIDDEN, (N_RES, HIDDEN, HIDDEN)),
        "b1":   lin(ks[3], HIDDEN, (N_RES, HIDDEN)),
        "w2":   lin(ks[4], HIDDEN, (N_RES, HIDDEN, HIDDEN)),
        "b2":   lin(ks[5], HIDDEN, (N_RES, HIDDEN)),
        "wh":   lin(ks[6], HIDDEN, (HIDDEN, HEAD_DIM)),
        "bh":   lin(ks[7], HIDDEN, (1, HEAD_DIM)),
    }


def ref_forward(x, p):
    """Pure-JAX reference of the deterministic PyTorch forward (same bf16 matmul numerics)."""
    bf, f32 = jnp.bfloat16, jnp.float32
    h = jax.nn.relu(jnp.dot(x.astype(bf), p["w_in"].astype(bf),
                            preferred_element_type=f32) + p["b_in"])
    for r in range(N_RES):
        res = h
        t = jax.nn.relu(jnp.dot(h.astype(bf), p["w1"][r].astype(bf),
                                preferred_element_type=f32) + p["b1"][r])
        h = jnp.dot(t.astype(bf), p["w2"][r].astype(bf),
                    preferred_element_type=f32) + p["b2"][r] + res
    out = jnp.dot(h.astype(bf), p["wh"].astype(bf),
                  preferred_element_type=f32) + p["bh"]
    means = out[:, :N_COMP * ACTION_DIM].reshape(-1, N_COMP, ACTION_DIM)
    wlog = out[:, -N_COMP:]
    idx = jnp.argmax(wlog, axis=-1)
    sm = jnp.take_along_axis(means, idx[:, None, None], axis=1)[:, 0]
    return jnp.tanh(sm) * jnp.array([6.0, 6.0, np.pi], jnp.float32)


if __name__ == "__main__":
    key = jax.random.PRNGKey(0)
    kx, kp, kx2 = jax.random.split(key, 3)
    params = init_params(kp)

    # small batch (single tile, rows padded to 16)
    x_small = jax.random.normal(kx, (8, INPUT_DIM), jnp.float32)   # batch=8, input_dim=32
    act_small = jax.block_until_ready(gmm_forward(x_small, params, deterministic=True))
    np.testing.assert_allclose(np.asarray(act_small), np.asarray(ref_forward(x_small, params)),
                               rtol=2e-2, atol=2e-2)
    assert act_small.shape == (8, ACTION_DIM)

    # larger batch exercising the two-step tiling + ragged tail padding
    x_big = jax.random.normal(kx2, (200, INPUT_DIM), jnp.float32)
    act_big = jax.block_until_ready(gmm_forward(x_big, params, deterministic=True))
    np.testing.assert_allclose(np.asarray(act_big), np.asarray(ref_forward(x_big, params)),
                               rtol=2e-2, atol=2e-2)
    assert act_big.shape == (200, ACTION_DIM)

    print("KERNEL_OK")
</pallas_src>

<mosaic_0001>
module attributes {stable_mosaic.version = 11 : i64} {
  func.func @gmm_forward_kernel(%arg0: i32, %arg1: memref<16x32xbf16, #tpu.memory_space<vmem>>, %arg2: memref<32x128xbf16, #tpu.memory_space<vmem>>, %arg3: memref<1x128xf32, #tpu.memory_space<vmem>>, %arg4: memref<4x128x128xbf16, #tpu.memory_space<vmem>>, %arg5: memref<4x128xf32, #tpu.memory_space<vmem>>, %arg6: memref<4x128x128xbf16, #tpu.memory_space<vmem>>, %arg7: memref<4x128xf32, #tpu.memory_space<vmem>>, %arg8: memref<128x64xbf16, #tpu.memory_space<vmem>>, %arg9: memref<1x64xf32, #tpu.memory_space<vmem>>, %arg10: memref<16x8xf32, #tpu.memory_space<vmem>>) attributes {dimension_semantics = [#tpu.dimension_semantics<parallel>], iteration_bounds = array<i64: 1>, scalar_prefetch = 0 : i64, scratch_operands = 0 : i64, tpu.core_type = #tpu.core_type<tc>, window_params = [{transform_indices = @transform_0, window_bounds = array<i64: 16, 32>}, {pipeline_mode = #tpu.pipeline_mode<synchronous>, transform_indices = @transform_1, window_bounds = array<i64: 32, 128>}, {pipeline_mode = #tpu.pipeline_mode<synchronous>, transform_indices = @transform_2, window_bounds = array<i64: 1, 128>}, {pipeline_mode = #tpu.pipeline_mode<synchronous>, transform_indices = @transform_3, window_bounds = array<i64: 4, 128, 128>}, {pipeline_mode = #tpu.pipeline_mode<synchronous>, transform_indices = @transform_4, window_bounds = array<i64: 4, 128>}, {pipeline_mode = #tpu.pipeline_mode<synchronous>, transform_indices = @transform_5, window_bounds = array<i64: 4, 128, 128>}, {pipeline_mode = #tpu.pipeline_mode<synchronous>, transform_indices = @transform_6, window_bounds = array<i64: 4, 128>}, {pipeline_mode = #tpu.pipeline_mode<synchronous>, transform_indices = @transform_7, window_bounds = array<i64: 128, 64>}, {pipeline_mode = #tpu.pipeline_mode<synchronous>, transform_indices = @transform_8, window_bounds = array<i64: 1, 64>}, {transform_indices = @transform_9, window_bounds = array<i64: 16, 8>}]} {
    %c0 = arith.constant 0 : index
    %c0_0 = arith.constant 0 : index
    %0 = vector.load %arg1[%c0, %c0_0] : memref<16x32xbf16, #tpu.memory_space<vmem>>, vector<16x32xbf16>
    %c0_1 = arith.constant 0 : index
    %c0_2 = arith.constant 0 : index
    %1 = vector.load %arg2[%c0_1, %c0_2] : memref<32x128xbf16, #tpu.memory_space<vmem>>, vector<32x128xbf16>
    %cst = arith.constant dense<0.000000e+00> : vector<16x128xf32>
    %2 = tpu.matmul %0, %1, %cst {dimension_numbers = #tpu.dot_dimension_numbers<[1], [0], [0], [1], [0, 0, 1, 1], [], []>} : vector<16x32xbf16>, vector<32x128xbf16>, vector<16x128xf32> -> vector<16x128xf32>
    %c0_3 = arith.constant 0 : index
    %c0_4 = arith.constant 0 : index
    %3 = vector.load %arg3[%c0_3, %c0_4] : memref<1x128xf32, #tpu.memory_space<vmem>>, vector<1x128xf32>
    %4 = vector.broadcast %3 : vector<1x128xf32> to vector<16x128xf32>
    %5 = arith.addf %2, %4 : vector<16x128xf32>
    %cst_5 = arith.constant 0.000000e+00 : f32
    %6 = vector.broadcast %cst_5 : f32 to vector<16x128xf32>
    %7 = arith.maximumf %5, %6 : vector<16x128xf32>
    %8 = arith.truncf %7 : vector<16x128xf32> to vector<16x128xbf16>
    %c0_6 = arith.constant 0 : index
    %c0_7 = arith.constant 0 : index
    %c0_8 = arith.constant 0 : index
    %9 = vector.load %arg4[%c0_6, %c0_7, %c0_8] : memref<4x128x128xbf16, #tpu.memory_space<vmem>>, vector<1x128x128xbf16>
    %10 = vector.shape_cast %9 : vector<1x128x128xbf16> to vector<128x128xbf16>
    %cst_9 = arith.constant dense<0.000000e+00> : vector<16x128xf32>
    %11 = tpu.matmul %8, %10, %cst_9 {dimension_numbers = #tpu.dot_dimension_numbers<[1], [0], [0], [1], [0, 0, 1, 1], [], []>} : vector<16x128xbf16>, vector<128x128xbf16>, vector<16x128xf32> -> vector<16x128xf32>
    %c0_10 = arith.constant 0 : index
    %c0_11 = arith.constant 0 : index
    %12 = vector.load %arg5[%c0_10, %c0_11] : memref<4x128xf32, #tpu.memory_space<vmem>>, vector<1x128xf32>
    %13 = vector.broadcast %12 : vector<1x128xf32> to vector<16x128xf32>
    %14 = arith.addf %11, %13 : vector<16x128xf32>
    %cst_12 = arith.constant 0.000000e+00 : f32
    %15 = vector.broadcast %cst_12 : f32 to vector<16x128xf32>
    %16 = arith.maximumf %14, %15 : vector<16x128xf32>
    %17 = arith.truncf %16 : vector<16x128xf32> to vector<16x128xbf16>
    %c0_13 = arith.constant 0 : index
    %c0_14 = arith.constant 0 : index
    %c0_15 = arith.constant 0 : index
    %18 = vector.load %arg6[%c0_13, %c0_14, %c0_15] : memref<4x128x128xbf16, #tpu.memory_space<vmem>>, vector<1x128x128xbf16>
    %19 = vector.shape_cast %18 : vector<1x128x128xbf16> to vector<128x128xbf16>
    %cst_16 = arith.constant dense<0.000000e+00> : vector<16x128xf32>
    %20 = tpu.matmul %17, %19, %cst_16 {dimension_numbers = #tpu.dot_dimension_numbers<[1], [0], [0], [1], [0, 0, 1, 1], [], []>} : vector<16x128xbf16>, vector<128x128xbf16>, vector<16x128xf32> -> vector<16x128xf32>
    %c0_17 = arith.constant 0 : index
    %c0_18 = arith.constant 0 : index
    %21 = vector.load %arg7[%c0_17, %c0_18] : memref<4x128xf32, #tpu.memory_space<vmem>>, vector<1x128xf32>
    %22 = vector.broadcast %21 : vector<1x128xf32> to vector<16x128xf32>
    %23 = arith.addf %20, %22 : vector<16x128xf32>
    %24 = arith.addf %23, %7 : vector<16x128xf32>
    %25 = arith.truncf %24 : vector<16x128xf32> to vector<16x128xbf16>
    %c1 = arith.constant 1 : index
    %c0_19 = arith.constant 0 : index
    %c0_20 = arith.constant 0 : index
    %26 = vector.load %arg4[%c1, %c0_19, %c0_20] : memref<4x128x128xbf16, #tpu.memory_space<vmem>>, vector<1x128x128xbf16>
    %27 = vector.shape_cast %26 : vector<1x128x128xbf16> to vector<128x128xbf16>
    %cst_21 = arith.constant dense<0.000000e+00> : vector<16x128xf32>
    %28 = tpu.matmul %25, %27, %cst_21 {dimension_numbers = #tpu.dot_dimension_numbers<[1], [0], [0], [1], [0, 0, 1, 1], [], []>} : vector<16x128xbf16>, vector<128x128xbf16>, vector<16x128xf32> -> vector<16x128xf32>
    %c1_22 = arith.constant 1 : index
    %c0_23 = arith.constant 0 : index
    %29 = vector.load %arg5[%c1_22, %c0_23] : memref<4x128xf32, #tpu.memory_space<vmem>>, vector<1x128xf32>
    %30 = vector.broadcast %29 : vector<1x128xf32> to vector<16x128xf32>
    %31 = arith.addf %28, %30 : vector<16x128xf32>
    %cst_24 = arith.constant 0.000000e+00 : f32
    %32 = vector.broadcast %cst_24 : f32 to vector<16x128xf32>
    %33 = arith.maximumf %31, %32 : vector<16x128xf32>
    %34 = arith.truncf %33 : vector<16x128xf32> to vector<16x128xbf16>
    %c1_25 = arith.constant 1 : index
    %c0_26 = arith.constant 0 : index
    %c0_27 = arith.constant 0 : index
    %35 = vector.load %arg6[%c1_25, %c0_26, %c0_27] : memref<4x128x128xbf16, #tpu.memory_space<vmem>>, vector<1x128x128xbf16>
    %36 = vector.shape_cast %35 : vector<1x128x128xbf16> to vector<128x128xbf16>
    %cst_28 = arith.constant dense<0.000000e+00> : vector<16x128xf32>
    %37 = tpu.matmul %34, %36, %cst_28 {dimension_numbers = #tpu.dot_dimension_numbers<[1], [0], [0], [1], [0, 0, 1, 1], [], []>} : vector<16x128xbf16>, vector<128x128xbf16>, vector<16x128xf32> -> vector<16x128xf32>
    %c1_29 = arith.constant 1 : index
    %c0_30 = arith.constant 0 : index
    %38 = vector.load %arg7[%c1_29, %c0_30] : memref<4x128xf32, #tpu.memory_space<vmem>>, vector<1x128xf32>
    %39 = vector.broadcast %38 : vector<1x128xf32> to vector<16x128xf32>
    %40 = arith.addf %37, %39 : vector<16x128xf32>
    %41 = arith.addf %40, %24 : vector<16x128xf32>
    %42 = arith.truncf %41 : vector<16x128xf32> to vector<16x128xbf16>
    %c2 = arith.constant 2 : index
    %c0_31 = arith.constant 0 : index
    %c0_32 = arith.constant 0 : index
    %43 = vector.load %arg4[%c2, %c0_31, %c0_32] : memref<4x128x128xbf16, #tpu.memory_space<vmem>>, vector<1x128x128xbf16>
    %44 = vector.shape_cast %43 : vector<1x128x128xbf16> to vector<128x128xbf16>
    %cst_33 = arith.constant dense<0.000000e+00> : vector<16x128xf32>
    %45 = tpu.matmul %42, %44, %cst_33 {dimension_numbers = #tpu.dot_dimension_numbers<[1], [0], [0], [1], [0, 0, 1, 1], [], []>} : vector<16x128xbf16>, vector<128x128xbf16>, vector<16x128xf32> -> vector<16x128xf32>
    %c2_34 = arith.constant 2 : index
    %c0_35 = arith.constant 0 : index
    %46 = vector.load %arg5[%c2_34, %c0_35] : memref<4x128xf32, #tpu.memory_space<vmem>>, vector<1x128xf32>
    %47 = vector.broadcast %46 : vector<1x128xf32> to vector<16x128xf32>
    %48 = arith.addf %45, %47 : vector<16x128xf32>
    %cst_36 = arith.constant 0.000000e+00 : f32
    %49 = vector.broadcast %cst_36 : f32 to vector<16x128xf32>
    %50 = arith.maximumf %48, %49 : vector<16x128xf32>
    %51 = arith.truncf %50 : vector<16x128xf32> to vector<16x128xbf16>
    %c2_37 = arith.constant 2 : index
    %c0_38 = arith.constant 0 : index
    %c0_39 = arith.constant 0 : index
    %52 = vector.load %arg6[%c2_37, %c0_38, %c0_39] : memref<4x128x128xbf16, #tpu.memory_space<vmem>>, vector<1x128x128xbf16>
    %53 = vector.shape_cast %52 : vector<1x128x128xbf16> to vector<128x128xbf16>
    %cst_40 = arith.constant dense<0.000000e+00> : vector<16x128xf32>
    %54 = tpu.matmul %51, %53, %cst_40 {dimension_numbers = #tpu.dot_dimension_numbers<[1], [0], [0], [1], [0, 0, 1, 1], [], []>} : vector<16x128xbf16>, vector<128x128xbf16>, vector<16x128xf32> -> vector<16x128xf32>
    %c2_41 = arith.constant 2 : index
    %c0_42 = arith.constant 0 : index
    %55 = vector.load %arg7[%c2_41, %c0_42] : memref<4x128xf32, #tpu.memory_space<vmem>>, vector<1x128xf32>
    %56 = vector.broadcast %55 : vector<1x128xf32> to vector<16x128xf32>
    %57 = arith.addf %54, %56 : vector<16x128xf32>
    %58 = arith.addf %57, %41 : vector<16x128xf32>
    %59 = arith.truncf %58 : vector<16x128xf32> to vector<16x128xbf16>
    %c3 = arith.constant 3 : index
    %c0_43 = arith.constant 0 : index
    %c0_44 = arith.constant 0 : index
    %60 = vector.load %arg4[%c3, %c0_43, %c0_44] : memref<4x128x128xbf16, #tpu.memory_space<vmem>>, vector<1x128x128xbf16>
    %61 = vector.shape_cast %60 : vector<1x128x128xbf16> to vector<128x128xbf16>
    %cst_45 = arith.constant dense<0.000000e+00> : vector<16x128xf32>
    %62 = tpu.matmul %59, %61, %cst_45 {dimension_numbers = #tpu.dot_dimension_numbers<[1], [0], [0], [1], [0, 0, 1, 1], [], []>} : vector<16x128xbf16>, vector<128x128xbf16>, vector<16x128xf32> -> vector<16x128xf32>
    %c3_46 = arith.constant 3 : index
    %c0_47 = arith.constant 0 : index
    %63 = vector.load %arg5[%c3_46, %c0_47] : memref<4x128xf32, #tpu.memory_space<vmem>>, vector<1x128xf32>
    %64 = vector.broadcast %63 : vector<1x128xf32> to vector<16x128xf32>
    %65 = arith.addf %62, %64 : vector<16x128xf32>
    %cst_48 = arith.constant 0.000000e+00 : f32
    %66 = vector.broadcast %cst_48 : f32 to vector<16x128xf32>
    %67 = arith.maximumf %65, %66 : vector<16x128xf32>
    %68 = arith.truncf %67 : vector<16x128xf32> to vector<16x128xbf16>
    %c3_49 = arith.constant 3 : index
    %c0_50 = arith.constant 0 : index
    %c0_51 = arith.constant 0 : index
    %69 = vector.load %arg6[%c3_49, %c0_50, %c0_51] : memref<4x128x128xbf16, #tpu.memory_space<vmem>>, vector<1x128x128xbf16>
    %70 = vector.shape_cast %69 : vector<1x128x128xbf16> to vector<128x128xbf16>
    %cst_52 = arith.constant dense<0.000000e+00> : vector<16x128xf32>
    %71 = tpu.matmul %68, %70, %cst_52 {dimension_numbers = #tpu.dot_dimension_numbers<[1], [0], [0], [1], [0, 0, 1, 1], [], []>} : vector<16x128xbf16>, vector<128x128xbf16>, vector<16x128xf32> -> vector<16x128xf32>
    %c3_53 = arith.constant 3 : index
    %c0_54 = arith.constant 0 : index
    %72 = vector.load %arg7[%c3_53, %c0_54] : memref<4x128xf32, #tpu.memory_space<vmem>>, vector<1x128xf32>
    %73 = vector.broadcast %72 : vector<1x128xf32> to vector<16x128xf32>
    %74 = arith.addf %71, %73 : vector<16x128xf32>
    %75 = arith.addf %74, %58 : vector<16x128xf32>
    %76 = arith.truncf %75 : vector<16x128xf32> to vector<16x128xbf16>
    %c0_55 = arith.constant 0 : index
    %c0_56 = arith.constant 0 : index
    %77 = vector.load %arg8[%c0_55, %c0_56] : memref<128x64xbf16, #tpu.memory_space<vmem>>, vector<128x64xbf16>
    %cst_57 = arith.constant dense<0.000000e+00> : vector<16x64xf32>
    %78 = tpu.matmul %76, %77, %cst_57 {dimension_numbers = #tpu.dot_dimension_numbers<[1], [0], [0], [1], [0, 0, 1, 1], [], []>} : vector<16x128xbf16>, vector<128x64xbf16>, vector<16x64xf32> -> vector<16x64xf32>
    %c0_58 = arith.constant 0 : index
    %c0_59 = arith.constant 0 : index
    %79 = vector.load %arg9[%c0_58, %c0_59] : memref<1x64xf32, #tpu.memory_space<vmem>>, vector<1x64xf32>
    %80 = vector.broadcast %79 : vector<1x64xf32> to vector<16x64xf32>
    %81 = arith.addf %78, %80 : vector<16x64xf32>
    %82 = vector.extract_strided_slice %81 {offsets = [0, 48], sizes = [16, 16], strides = [1, 1]} : vector<16x64xf32> to vector<16x16xf32>
    %83 = tpu.iota {dimensions = array<i32: 1>} : vector<16x16xi32>
    %cst_60 = arith.constant dense<0xFF800000> : vector<16xf32>
    %84 = vector.multi_reduction <maximumf>, %82, %cst_60 [1] : vector<16x16xf32> to vector<16xf32>
    %85 = vector.shape_cast %84 : vector<16xf32> to vector<16x1xf32>
    %86 = vector.broadcast %85 : vector<16x1xf32> to vector<16x16xf32>
    %87 = arith.cmpf oeq, %82, %86 : vector<16x16xf32>
    %c16_i32 = arith.constant 16 : i32
    %88 = vector.broadcast %c16_i32 : i32 to vector<16x16xi32>
    %89 = arith.select %87, %83, %88 : vector<16x16xi1>, vector<16x16xi32>
    %cst_61 = arith.constant dense<2147483647> : vector<16xi32>
    %90 = vector.multi_reduction <minsi>, %89, %cst_61 [1] : vector<16x16xi32> to vector<16xi32>
    %91 = vector.shape_cast %90 : vector<16xi32> to vector<16x1xi32>
    %92 = vector.broadcast %91 : vector<16x1xi32> to vector<16x16xi32>
    %93 = arith.cmpi eq, %83, %92 : vector<16x16xi32>
    %94 = vector.extract_strided_slice %81 {offsets = [0, 0], sizes = [16, 16], strides = [1, 1]} : vector<16x64xf32> to vector<16x16xf32>
    %cst_62 = arith.constant 0.000000e+00 : f32
    %95 = vector.broadcast %cst_62 : f32 to vector<16x16xf32>
    %96 = arith.select %93, %94, %95 : vector<16x16xi1>, vector<16x16xf32>
    %cst_63 = arith.constant dense<0.000000e+00> : vector<16xf32>
    %97 = vector.multi_reduction <add>, %96, %cst_63 [1] : vector<16x16xf32> to vector<16xf32>
    %98 = vector.shape_cast %97 : vector<16xf32> to vector<16x1xf32>
    %99 = math.tanh %98 : vector<16x1xf32>
    %cst_64 = arith.constant 6.000000e+00 : f32
    %100 = vector.broadcast %cst_64 : f32 to vector<16x1xf32>
    %101 = arith.mulf %99, %100 : vector<16x1xf32>
    %102 = vector.extract_strided_slice %81 {offsets = [0, 16], sizes = [16, 16], strides = [1, 1]} : vector<16x64xf32> to vector<16x16xf32>
    %cst_65 = arith.constant 0.000000e+00 : f32
    %103 = vector.broadcast %cst_65 : f32 to vector<16x16xf32>
    %104 = arith.select %93, %102, %103 : vector<16x16xi1>, vector<16x16xf32>
    %cst_66 = arith.constant dense<0.000000e+00> : vector<16xf32>
    %105 = vector.multi_reduction <add>, %104, %cst_66 [1] : vector<16x16xf32> to vector<16xf32>
    %106 = vector.shape_cast %105 : vector<16xf32> to vector<16x1xf32>
    %107 = math.tanh %106 : vector<16x1xf32>
    %cst_67 = arith.constant 6.000000e+00 : f32
    %108 = vector.broadcast %cst_67 : f32 to vector<16x1xf32>
    %109 = arith.mulf %107, %108 : vector<16x1xf32>
    %110 = vector.extract_strided_slice %81 {offsets = [0, 32], sizes = [16, 16], strides = [1, 1]} : vector<16x64xf32> to vector<16x16xf32>
    %cst_68 = arith.constant 0.000000e+00 : f32
    %111 = vector.broadcast %cst_68 : f32 to vector<16x16xf32>
    %112 = arith.select %93, %110, %111 : vector<16x16xi1>, vector<16x16xf32>
    %cst_69 = arith.constant dense<0.000000e+00> : vector<16xf32>
    %113 = vector.multi_reduction <add>, %112, %cst_69 [1] : vector<16x16xf32> to vector<16xf32>
    %114 = vector.shape_cast %113 : vector<16xf32> to vector<16x1xf32>
    %115 = math.tanh %114 : vector<16x1xf32>
    %cst_70 = arith.constant 3.14159274 : f32
    %116 = vector.broadcast %cst_70 : f32 to vector<16x1xf32>
    %117 = arith.mulf %115, %116 : vector<16x1xf32>
    %cst_71 = arith.constant 0.000000e+00 : f32
    %118 = vector.broadcast %cst_71 : f32 to vector<16x5xf32>
    %119 = tpu.concatenate %101, %109, %117, %118 in 1 : vector<16x1xf32>, vector<16x1xf32>, vector<16x1xf32>, vector<16x5xf32> -> vector<16x8xf32>
    %c0_72 = arith.constant 0 : index
    %c0_73 = arith.constant 0 : index
    %120 = vector.load %arg10[%c0_72, %c0_73] : memref<16x8xf32, #tpu.memory_space<vmem>>, vector<16x8xf32>
    tpu.vector_store %arg10[%c0_72, %c0_73], %119 {strides = array<i32>} : memref<16x8xf32, #tpu.memory_space<vmem>>, vector<16x8xf32>,
    return
  }
  func.func @transform_0(%arg0: i32) -> (i32, i32) {
    %c0_i32 = arith.constant 0 : i32
    %c0_i32_0 = arith.constant 0 : i32
    return %arg0, %c0_i32 : i32, i32
  }
  func.func @transform_1(%arg0: i32) -> (i32, i32) {
    %c0_i32 = arith.constant 0 : i32
    %c0_i32_0 = arith.constant 0 : i32
    %c0_i32_1 = arith.constant 0 : i32
    return %c0_i32, %c0_i32_0 : i32, i32
  }
  func.func @transform_2(%arg0: i32) -> (i32, i32) {
    %c0_i32 = arith.constant 0 : i32
    %c0_i32_0 = arith.constant 0 : i32
    %c0_i32_1 = arith.constant 0 : i32
    return %c0_i32, %c0_i32_0 : i32, i32
  }
  func.func @transform_3(%arg0: i32) -> (i32, i32, i32) {
    %c0_i32 = arith.constant 0 : i32
    %c0_i32_0 = arith.constant 0 : i32
    %c0_i32_1 = arith.constant 0 : i32
    %c0_i32_2 = arith.constant 0 : i32
    return %c0_i32, %c0_i32_0, %c0_i32_1 : i32, i32, i32
  }
  func.func @transform_4(%arg0: i32) -> (i32, i32) {
    %c0_i32 = arith.constant 0 : i32
    %c0_i32_0 = arith.constant 0 : i32
    %c0_i32_1 = arith.constant 0 : i32
    return %c0_i32, %c0_i32_0 : i32, i32
  }
  func.func @transform_5(%arg0: i32) -> (i32, i32, i32) {
    %c0_i32 = arith.constant 0 : i32
    %c0_i32_0 = arith.constant 0 : i32
    %c0_i32_1 = arith.constant 0 : i32
    %c0_i32_2 = arith.constant 0 : i32
    return %c0_i32, %c0_i32_0, %c0_i32_1 : i32, i32, i32
  }
  func.func @transform_6(%arg0: i32) -> (i32, i32) {
    %c0_i32 = arith.constant 0 : i32
    %c0_i32_0 = arith.constant 0 : i32
    %c0_i32_1 = arith.constant 0 : i32
    return %c0_i32, %c0_i32_0 : i32, i32
  }
  func.func @transform_7(%arg0: i32) -> (i32, i32) {
    %c0_i32 = arith.constant 0 : i32
    %c0_i32_0 = arith.constant 0 : i32
    %c0_i32_1 = arith.constant 0 : i32
    return %c0_i32, %c0_i32_0 : i32, i32
  }
  func.func @transform_8(%arg0: i32) -> (i32, i32) {
    %c0_i32 = arith.constant 0 : i32
    %c0_i32_0 = arith.constant 0 : i32
    %c0_i32_1 = arith.constant 0 : i32
    return %c0_i32, %c0_i32_0 : i32, i32
  }
  func.func @transform_9(%arg0: i32) -> (i32, i32) {
    %c0_i32 = arith.constant 0 : i32
    %c0_i32_0 = arith.constant 0 : i32
    return %arg0, %c0_i32 : i32, i32
  }
}

</mosaic_0001>

<bundles_post_ra>
// kernel: tpu_custom_call.1
= control target key start
LH: loop header
LB: loop body
LE: loop exit
PB: predicated region body
PF: predicated region fallthrough
CT: control target
= control target key end

     0   :  { %14 = vsyncpa [#allocation3], 0  ;;  %s1593_s0 = inlined_call_operand.vmem [shape: bf16[16,32], index: 0, kind: input, shape index: {}]   ;;  %s1594_s1 = inlined_call_operand.vmem [shape: bf16[32,128], index: 1, kind: input, shape index: {}]   ;;  %s1595_s2 = inlined_call_operand.vmem [shape: f32[1,128], index: 2, kind: input, shape index: {}]   ;;  %s1596_s3 = inlined_call_operand.hbm [shape: bf16[4,128,128], index: 3, kind: input, shape index: {}]   ;;  %s1597_s4 = inlined_call_operand.vmem [shape: f32[4,128], index: 4, kind: input, shape index: {}]   ;;  %s1598_s5 = inlined_call_operand.hbm [shape: bf16[4,128,128], index: 5, kind: input, shape index: {}]   ;;  %s1599_s6 = inlined_call_operand.vmem [shape: f32[4,128], index: 6, kind: input, shape index: {}]   ;;  %s1600_s7 = inlined_call_operand.vmem [shape: bf16[128,64], index: 7, kind: input, shape index: {}]   ;;  %s1601_s8 = inlined_call_operand.vmem [shape: f32[1,64], index: 8, kind: input, shape index: {}]   ;;  %s1602_s9 = inlined_call_operand.vmem [shape: f32[16,8], index: 9, kind: output, shape index: {}]  }
   0x1   :  { %s26_s11 = sshll.u32 %s1596_s3, 4  ;;  %s27_s11 = int_to_ptr.hbm [resolvable:$true] %s26_s11 }
   0x2   :  { %15 = vsyncpa [#allocation5], 0  ;;  %s1438_s12 = smov [#allocation2]   ;;  %s41_s16 = sshll.u32 %s1598_s5, 4  ;;  %s42_s16 = int_to_ptr.hbm [resolvable:$true] %s41_s16 }
   0x3   :  { %s28_s13 = sshll.u32 %s1438_s12, 4  ;;  %s1439_s17 = smov 64   ;;  %s29_s13 = int_to_ptr.vmem [resolvable:$true] %s28_s13 }
   0x4   :  { %s1440_s18 = smov 4   ;;  %s1441_s19 = smov [#allocation4]  }
   0x5   :  { %34 = dma.hbm_to_vmem [thread:$0]  %s27_s11, 4096, %s29_s13, [#allocation3], %s1439_s17, %s1439_s17, %s1440_s18  }
   0x6   :  { %s43_s20 = sshll.u32 %s1441_s19, 4  ;;  %s44_s20 = int_to_ptr.vmem [resolvable:$true] %s43_s20 }
   0x7   :  { %49 = dma.hbm_to_vmem [thread:$0]  %s42_s16, 4096, %s44_s20, [#allocation5], %s1439_s17, %s1439_s17, %s1440_s18  }
   0x8   :  { %1434 = dma.done.wait [#allocation3], 4096  }
   0x9   :  { %1435 = vsyncadd [#allocation3], 4294963200 }
   0xa   :  { %1436 = dma.done.wait [#allocation5], 4096  }
   0xb   :  { %1437 = vsyncadd [#allocation5], 4294963200  ;;  %v1284_v0 = vld [vmem:[%s1594_s1 + $0x8] sm:$0xff]  ;;  %v1292_v1 = vld [vmem:[#allocation2 + $0x38] sm:$0xff]  ;;  %vm92_vm0 = vcmask 261120   ;;  %s1442_s29 = smov 48  }
   0xc   :  { %102 = vmatpush.bf16.msra.mxu0 %v1284_v0  ;;  %v1283_v2 = vld [vmem:[%s1594_s1] sm:$0xff]  ;;  %v1291_v3 = vld [vmem:[#allocation2 + $0x30] sm:$0xff]  ;;  %179 = vmatpush.bf16.msra.mxu1 %v1292_v1  ;;  %v1290_v5 = vld [vmem:[#allocation2 + $0x28] sm:$0xff]  ;;  %vm867_vm1 = vcmask 523648   ;;  %vm914_vm6 = vcmask 130048   ;;  %vm963_vm9 = vcmask 7168  }
   0xd   :  { %v1282_v4 = vld [vmem:[%s1593_s0] sm:$0xff]  ;;  %v1288_v7 = vld [vmem:[#allocation2 + $0x18] sm:$0xff]  ;;  %v1287_v8 = vld [vmem:[#allocation2 + $0x10] sm:$0xff]  ;;  %vm966_vm10 = vcmask 15360   ;;  %vm969_vm11 = vcmask 23552   ;;  %vm972_vm12 = vcmask 64512  }
   0xe   :  { %v1289_v6 = vld [vmem:[#allocation2 + $0x20] sm:$0xff]  ;;  %v1286_v9 = vld [vmem:[#allocation2 + $0x8] sm:$0xff]  ;;  %v1300_v11 = vld [vmem:[#allocation4 + $0x38] sm:$0xff] }
   0xf   :  { %v1285_v10 = vld [vmem:[#allocation2] sm:$0xff]  ;;  %262 = vmatpush.bf16.msra.mxu2 %v1300_v11  ;;  %v1299_v12 = vld [vmem:[#allocation4 + $0x30] sm:$0xff]  ;;  %v1298_v13 = vld [vmem:[#allocation4 + $0x28] sm:$0xff] }
  0x10   :  { %103 = vmatpush.bf16.msra.mxu0 %v1283_v2  ;;  %180 = vmatpush.bf16.msra.mxu1 %v1291_v3  ;;  %v1297_v14 = vld [vmem:[#allocation4 + $0x20] sm:$0xff]  ;;  %v1296_v23 = vld [vmem:[#allocation4 + $0x18] sm:$0xff]  ;;  %v1295_v24 = vld [vmem:[#allocation4 + $0x10] sm:$0xff] }
  0x11   :  { %v1364_v16 = vld [vmem:[%s1595_s2] ss:$0 sm:$0xff]  ;;  %v1294_v25 = vld [vmem:[#allocation4 + $0x8] sm:$0xff]  ;;  %v1308_v27 = vld [vmem:[#allocation2 + $0x78] sm:$0xff] }
  0x12   :  { %v1293_v26 = vld [vmem:[#allocation4] sm:$0xff]  ;;  %346 = vmatpush.bf16.msra.mxu3 %v1308_v27  ;;  %v1307_v28 = vld [vmem:[#allocation2 + $0x70] sm:$0xff]  ;;  %v1306_v29 = vld [vmem:[#allocation2 + $0x68] sm:$0xff] }
  0x13   :  { %993 = vmatmul.msk.bf16.vlgmr.msra.gmra.mxu0 %vm92_vm0, %v1282_v4  ;;  %263 = vmatpush.bf16.msra.mxu2 %v1299_v12  ;;  %v1305_v30 = vld [vmem:[#allocation2 + $0x60] sm:$0xff]  ;;  %v1304_v39 = vld [vmem:[#allocation2 + $0x58] sm:$0xff]  ;;  %v1303_v40 = vld [vmem:[#allocation2 + $0x50] sm:$0xff] }
  0x14   :  { %181 = vmatpush.bf16.msra.mxu1 %v1290_v5  ;;  %v1365_v32 = vld [vmem:[%s1597_s4] ss:$0 sm:$0xff]  ;;  %v1302_v41 = vld [vmem:[#allocation2 + $0x48] sm:$0xff]  ;;  %v1316_v43 = vld [vmem:[#allocation4 + $0x78] sm:$0xff] }
  0x15   :  { %v1301_v42 = vld [vmem:[#allocation2 + $0x40] sm:$0xff]  ;;  %430 = vmatpush.bf16.msrb.mxu0 %v1316_v43  ;;  %v1315_v44 = vld [vmem:[#allocation4 + $0x70] sm:$0xff]  ;;  %v1314_v45 = vld [vmem:[#allocation4 + $0x68] sm:$0xff] }
  0x16   :  { %347 = vmatpush.bf16.msra.mxu3 %v1307_v28  ;;  %v1313_v46 = vld [vmem:[#allocation4 + $0x60] sm:$0xff]  ;;  %v1312_v55 = vld [vmem:[#allocation4 + $0x58] sm:$0xff]  ;;  %v1311_v56 = vld [vmem:[#allocation4 + $0x50] sm:$0xff] }
  0x17   :  { %264 = vmatpush.bf16.msra.mxu2 %v1298_v13  ;;  %v1366_v48 = vld [vmem:[%s1599_s6] ss:$0 sm:$0xff]  ;;  %v1310_v57 = vld [vmem:[#allocation4 + $0x48] sm:$0xff]  ;;  %v1324_v59 = vld [vmem:[#allocation2 + $0xb8] sm:$0xff] }
  0x18   :  { %182 = vmatpush.bf16.msra.mxu1 %v1289_v6  ;;  %v1309_v58 = vld [vmem:[#allocation4 + $0x40] sm:$0xff]  ;;  %v1323_v60 = vld [vmem:[#allocation2 + $0xb0] sm:$0xff]  ;;  %v1322_v61 = vld [vmem:[#allocation2 + $0xa8] sm:$0xff] }
  0x19   :  { %431 = vmatpush.bf16.msrb.mxu0 %v1315_v44  ;;  %v1321_v62 = vld [vmem:[#allocation2 + $0xa0] sm:$0xff]  ;;  %v1332_v11 = vld [vmem:[#allocation4 + $0xb8] sm:$0xff]  ;;  %v1331_v12 = vld [vmem:[#allocation4 + $0xb0] sm:$0xff] }
  0x1a   :  { %348 = vmatpush.bf16.msra.mxu3 %v1306_v29  ;;  %v1367_v0 = vld [vmem:[%s1597_s4 + $0x1] ss:$0 sm:$0xff]  ;;  %v1330_v13 = vld [vmem:[#allocation4 + $0xa8] sm:$0xff]  ;;  %v1340_v27 = vld [vmem:[#allocation2 + $0xf8] sm:$0xff] }
  0x1b   :  { %265 = vmatpush.bf16.msra.mxu2 %v1297_v14  ;;  %v1329_v14 = vld [vmem:[#allocation4 + $0xa0] sm:$0xff]  ;;  %v1339_v28 = vld [vmem:[#allocation2 + $0xf0] sm:$0xff]  ;;  %v1338_v29 = vld [vmem:[#allocation2 + $0xe8] sm:$0xff] }
  0x1c   :  { %183 = vmatpush.bf16.msra.mxu1 %v1288_v7  ;;  %v1320_v7 = vld [vmem:[#allocation2 + $0x98] sm:$0xff]  ;;  %v1347_v44 = vld [vmem:[#allocation4 + $0xf0] sm:$0xff] }
  0x1d   :  { %432 = vmatpush.bf16.msrb.mxu0 %v1314_v45  ;;  %v1348_v43 = vld [vmem:[#allocation4 + $0xf8] sm:$0xff]  ;;  %v1346_v45 = vld [vmem:[#allocation4 + $0xe8] sm:$0xff] }
  0x1e   :  { %349 = vmatpush.bf16.msra.mxu3 %v1305_v30  ;;  %v1337_v30 = vld [vmem:[#allocation2 + $0xe0] sm:$0xff] }
  0x1f   :  { %266 = vmatpush.bf16.msra.mxu2 %v1296_v23  ;;  %v1328_v23 = vld [vmem:[#allocation4 + $0x98] sm:$0xff] }
  0x20   :  { %184 = vmatpush.bf16.msra.mxu1 %v1287_v8  ;;  %v1319_v8 = vld [vmem:[#allocation2 + $0x90] sm:$0xff] }
  0x21   :  { %433 = vmatpush.bf16.msrb.mxu0 %v1313_v46  ;;  %v1345_v46 = vld [vmem:[#allocation4 + $0xe0] sm:$0xff] }
  0x22   :  { %350 = vmatpush.bf16.msra.mxu3 %v1304_v39  ;;  %v1336_v39 = vld [vmem:[#allocation2 + $0xd8] sm:$0xff] }
  0x23   :  { %267 = vmatpush.bf16.msra.mxu2 %v1295_v24  ;;  %v1327_v24 = vld [vmem:[#allocation4 + $0x90] sm:$0xff] }
  0x24   :  { %185 = vmatpush.bf16.msra.mxu1 %v1286_v9  ;;  %v1318_v9 = vld [vmem:[#allocation2 + $0x88] sm:$0xff] }
  0x25   :  { %434 = vmatpush.bf16.msrb.mxu0 %v1312_v55  ;;  %v1344_v55 = vld [vmem:[#allocation4 + $0xd8] sm:$0xff] }
  0x26   :  { %351 = vmatpush.bf16.msra.mxu3 %v1303_v40  ;;  %v1335_v40 = vld [vmem:[#allocation2 + $0xd0] sm:$0xff] }
  0x27   :  { %268 = vmatpush.bf16.msra.mxu2 %v1294_v25  ;;  %v1326_v25 = vld [vmem:[#allocation4 + $0x88] sm:$0xff] }
  0x28   :  { %186 = vmatpush.bf16.msra.mxu1 %v1285_v10  ;;  %v1317_v10 = vld [vmem:[#allocation2 + $0x80] sm:$0xff] }
  0x29   :  { %435 = vmatpush.bf16.msrb.mxu0 %v1311_v56  ;;  %v1343_v56 = vld [vmem:[#allocation4 + $0xd0] sm:$0xff] }
  0x2a   :  { %352 = vmatpush.bf16.msra.mxu3 %v1302_v41  ;;  %v1334_v41 = vld [vmem:[#allocation2 + $0xc8] sm:$0xff] }
  0x2b   :  { %269 = vmatpush.bf16.msra.mxu2 %v1293_v26  ;;  %v1325_v26 = vld [vmem:[#allocation4 + $0x80] sm:$0xff] }
  0x2c   :  { %514 = vmatpush.bf16.msrb.mxu1 %v1324_v59  ;;  %v1356_v59 = vld [vmem:[%s1600_s7 + $0x38] sm:$0xff] }
  0x2d   :  { %436 = vmatpush.bf16.msrb.mxu0 %v1310_v57  ;;  %v1342_v57 = vld [vmem:[#allocation4 + $0xc8] sm:$0xff] }
  0x2e   :  { %353 = vmatpush.bf16.msra.mxu3 %v1301_v42  ;;  %v1333_v42 = vld [vmem:[#allocation2 + $0xc0] sm:$0xff] }
  0x2f   :  { %598 = vmatpush.bf16.msrb.mxu2 %v1332_v11 }
  0x30   :  { %515 = vmatpush.bf16.msrb.mxu1 %v1323_v60  ;;  %v1355_v60 = vld [vmem:[%s1600_s7 + $0x30] sm:$0xff] }
  0x31   :  { %437 = vmatpush.bf16.msrb.mxu0 %v1309_v58  ;;  %v1341_v58 = vld [vmem:[#allocation4 + $0xc0] sm:$0xff] }
  0x32   :  { %682 = vmatpush.bf16.msrb.mxu3 %v1340_v27 }
  0x33   :  { %599 = vmatpush.bf16.msrb.mxu2 %v1331_v12  ;;  %v1372_v12 = vld [vmem:[%s1599_s6 + $0x3] ss:$0 sm:$0xff] }
  0x34   :  { %516 = vmatpush.bf16.msrb.mxu1 %v1322_v61  ;;  %v1354_v61 = vld [vmem:[%s1600_s7 + $0x28] sm:$0xff] }
  0x35   :  { %766 = vmatpush.bf16.msra.mxu0 %v1348_v43 }
  0x36   :  { %683 = vmatpush.bf16.msrb.mxu3 %v1339_v28 }
  0x37   :  { %600 = vmatpush.bf16.msrb.mxu2 %v1330_v13 }
  0x38   :  { %517 = vmatpush.bf16.msrb.mxu1 %v1321_v62  ;;  %v1353_v62 = vld [vmem:[%s1600_s7 + $0x20] sm:$0xff] }
  0x39   :  { %767 = vmatpush.bf16.msra.mxu0 %v1347_v44 }
  0x3a   :  { %684 = vmatpush.bf16.msrb.mxu3 %v1338_v29 }
  0x3b   :  { %601 = vmatpush.bf16.msrb.mxu2 %v1329_v14 }
  0x3c   :  { %518 = vmatpush.bf16.msrb.mxu1 %v1320_v7  ;;  %v1352_v7 = vld [vmem:[%s1600_s7 + $0x18] sm:$0xff] }
  0x3d   :  { %768 = vmatpush.bf16.msra.mxu0 %v1346_v45 }
  0x3e   :  { %685 = vmatpush.bf16.msrb.mxu3 %v1337_v30 }
  0x3f   :  { %602 = vmatpush.bf16.msrb.mxu2 %v1328_v23 }
  0x40   :  { %519 = vmatpush.bf16.msrb.mxu1 %v1319_v8  ;;  %v1351_v8 = vld [vmem:[%s1600_s7 + $0x10] sm:$0xff] }
  0x41   :  { %769 = vmatpush.bf16.msra.mxu0 %v1345_v46 }
  0x42   :  { %686 = vmatpush.bf16.msrb.mxu3 %v1336_v39 }
  0x43   :  { %603 = vmatpush.bf16.msrb.mxu2 %v1327_v24 }
  0x44   :  { %520 = vmatpush.bf16.msrb.mxu1 %v1318_v9  ;;  %v1350_v9 = vld [vmem:[%s1600_s7 + $0x8] sm:$0xff] }
  0x45   :  { %770 = vmatpush.bf16.msra.mxu0 %v1344_v55 }
  0x46   :  { %687 = vmatpush.bf16.msrb.mxu3 %v1335_v40 }
  0x47   :  { %604 = vmatpush.bf16.msrb.mxu2 %v1326_v25 }
  0x48   :  { %521 = vmatpush.bf16.msrb.mxu1 %v1317_v10  ;;  %v1349_v10 = vld [vmem:[%s1600_s7] sm:$0xff] }
  0x49   :  { %771 = vmatpush.bf16.msra.mxu0 %v1343_v56 }
  0x4a   :  { %688 = vmatpush.bf16.msrb.mxu3 %v1334_v41 }
  0x4b   :  { %605 = vmatpush.bf16.msrb.mxu2 %v1325_v26 }
  0x4d   :  { %772 = vmatpush.bf16.msra.mxu0 %v1342_v57 }
  0x4e   :  { %689 = vmatpush.bf16.msrb.mxu3 %v1333_v42 }
  0x51   :  { %773 = vmatpush.bf16.msra.mxu0 %v1341_v58 }
  0x90   :  { %v105_v15 = vpop.f32.mrf.mxu0 }
  0x91   :  { %v106_v17 = vadd.f32 %v1364_v16, %v105_v15 }
  0x93   :  { %v110_v20 = vmax.f32 %v106_v17, 0.0 }
  0x98   :  { %v107_v18 = vpop.f32.mrf.mxu0 }
  0x99   :  { %v108_v19 = vadd.f32 %v1364_v16, %v107_v18  ;;  %v1368_v16 = vld [vmem:[%s1599_s6 + $0x1] ss:$0 sm:$0xff] }
  0x9b   :  { %v111_v21 = vmax.f32 %v108_v19, 0.0 }
  0x9d   :  { %v112_v22 = vpack.c.bf16 %v111_v21, %v110_v20 }
  0x9f   :  { %187 = vmatmul.bf16.vlgmr.msra.gmra.mxu1 %v112_v22 }
  0xa0   :  { %851 = vmatpush.bf16.msra.mxu1 %v1356_v59 }
  0xa4   :  { %852 = vmatpush.bf16.msra.mxu1 %v1355_v60 }
  0xa8   :  { %853 = vmatpush.bf16.msra.mxu1 %v1354_v61 }
  0xac   :  { %854 = vmatpush.bf16.msra.mxu1 %v1353_v62 }
  0xb0   :  { %855 = vmatpush.bf16.msra.mxu1 %v1352_v7 }
  0xb4   :  { %856 = vmatpush.bf16.msra.mxu1 %v1351_v8 }
  0xb8   :  { %857 = vmatpush.bf16.msra.mxu1 %v1350_v9 }
  0xbc   :  { %858 = vmatpush.bf16.msra.mxu1 %v1349_v10 }
 0x11c   :  { %v188_v31 = vpop.f32.mrf.mxu1 }
 0x11d   :  { %v189_v33 = vadd.f32 %v1365_v32, %v188_v31 }
 0x11f   :  { %v193_v36 = vmax.f32 %v189_v33, 0.0 }
 0x124   :  { %v190_v34 = vpop.f32.mrf.mxu1 }
 0x125   :  { %v191_v35 = vadd.f32 %v1365_v32, %v190_v34  ;;  %v1369_v32 = vld [vmem:[%s1597_s4 + $0x2] ss:$0 sm:$0xff] }
 0x127   :  { %v194_v37 = vmax.f32 %v191_v35, 0.0 }
 0x129   :  { %v195_v38 = vpack.c.bf16 %v194_v37, %v193_v36 }
 0x12b   :  { %270 = vmatmul.bf16.vlgmr.msra.gmra.mxu2 %v195_v38 }
 0x1ae   :  { %v271_v47 = vpop.f32.mrf.mxu2 }
 0x1af   :  { %v272_v49 = vadd.f32 %v1366_v48, %v271_v47 }
 0x1b1   :  { %v276_v52 = vadd.f32 %v272_v49, %v110_v20 }
 0x1b6   :  { %v273_v50 = vpop.f32.mrf.mxu2 }
 0x1b7   :  { %v274_v51 = vadd.f32 %v1366_v48, %v273_v50  ;;  %v1370_v48 = vld [vmem:[%s1599_s6 + $0x2] ss:$0 sm:$0xff]  ;;  %s1443_s6 = smov 112  }
 0x1b9   :  { %v277_v53 = vadd.f32 %v274_v51, %v111_v21 }
 0x1bb   :  { %v278_v54 = vpack.c.bf16 %v277_v53, %v276_v52 }
 0x1bd   :  { %354 = vmatmul.bf16.vlgmr.msra.gmra.mxu3 %v278_v54 }
 0x240   :  { %v355_v63 = vpop.f32.mrf.mxu3 }
 0x241   :  { %v356_v1 = vadd.f32 %v1367_v0, %v355_v63 }
 0x243   :  { %v360_v4 = vmax.f32 %v356_v1, 0.0 }
 0x248   :  { %v357_v2 = vpop.f32.mrf.mxu3 }
 0x249   :  { %v358_v3 = vadd.f32 %v1367_v0, %v357_v2  ;;  %v1371_v0 = vld [vmem:[%s1597_s4 + $0x3] ss:$0 sm:$0xff] }
 0x24b   :  { %v361_v5 = vmax.f32 %v358_v3, 0.0 }
 0x24d   :  { %v362_v6 = vpack.c.bf16 %v361_v5, %v360_v4 }
 0x24f   :  { %438 = vmatmul.bf16.vlgmr.msrb.gmra.mxu0 %v362_v6 }
 0x2cc   :  { %v439_v15 = vpop.f32.mrf.mxu0 }
 0x2cd   :  { %v440_v17 = vadd.f32 %v1368_v16, %v439_v15 }
 0x2cf   :  { %v444_v20 = vadd.f32 %v440_v17, %v276_v52 }
 0x2d4   :  { %v441_v18 = vpop.f32.mrf.mxu0 }
 0x2d5   :  { %v442_v19 = vadd.f32 %v1368_v16, %v441_v18 }
 0x2d7   :  { %v445_v21 = vadd.f32 %v442_v19, %v277_v53  ;;  %v865_v19 = vlaneseq }
 0x2d9   :  { %v446_v22 = vpack.c.bf16 %v445_v21, %v444_v20 }
 0x2db   :  { %522 = vmatmul.bf16.vlgmr.msrb.gmra.mxu1 %v446_v22 }
 0x358   :  { %v523_v31 = vpop.f32.mrf.mxu1 }
 0x359   :  { %v524_v33 = vadd.f32 %v1369_v32, %v523_v31 }
 0x35b   :  { %v528_v36 = vmax.f32 %v524_v33, 0.0 }
 0x360   :  { %v525_v34 = vpop.f32.mrf.mxu1 }
 0x361   :  { %v526_v35 = vadd.f32 %v1369_v32, %v525_v34 }
 0x363   :  { %v529_v37 = vmax.f32 %v526_v35, 0.0 }
 0x365   :  { %v530_v38 = vpack.c.bf16 %v529_v37, %v528_v36 }
 0x367   :  { %606 = vmatmul.bf16.vlgmr.msrb.gmra.mxu2 %v530_v38 }
 0x3ea   :  { %v607_v47 = vpop.f32.mrf.mxu2 }
 0x3eb   :  { %v608_v49 = vadd.f32 %v1370_v48, %v607_v47 }
 0x3ed   :  { %v612_v52 = vadd.f32 %v608_v49, %v444_v20  ;;  %v1561_v20 = vand.u32 127, %v865_v19 }
 0x3ef   :  { %876 = vrot.lane.b32.xlu1 %v1561_v20, %s1442_s29 }
 0x3f2   :  { %v609_v50 = vpop.f32.mrf.mxu2 }
 0x3f3   :  { %v610_v51 = vadd.f32 %v1370_v48, %v609_v50 }
 0x3f5   :  { %v613_v53 = vadd.f32 %v610_v51, %v445_v21  ;;  %v1373_v21 = vld [vmem:[%s1601_s8] ss:$0 sm:$0xff]  ;;  %s1444_s8 = smov 96  }
 0x3f7   :  { %v614_v54 = vpack.c.bf16 %v613_v53, %v612_v52 }
 0x3f9   :  { %690 = vmatmul.bf16.vlgmr.msrb.gmra.mxu3 %v614_v54 }
 0x461   :  { %v877_v28 = vpop.permute.xlu1 %876 }
 0x47c   :  { %v691_v63 = vpop.f32.mrf.mxu3 }
 0x47d   :  { %v692_v1 = vadd.f32 %v1371_v0, %v691_v63 }
 0x47f   :  { %v696_v4 = vmax.f32 %v692_v1, 0.0 }
 0x484   :  { %v693_v2 = vpop.f32.mrf.mxu3 }
 0x485   :  { %v694_v3 = vadd.f32 %v1371_v0, %v693_v2 }
 0x487   :  { %v697_v5 = vmax.f32 %v694_v3, 0.0 }
 0x489   :  { %v698_v6 = vpack.c.bf16 %v697_v5, %v696_v4 }
 0x48b   :  { %774 = vmatmul.bf16.vlgmr.msra.gmra.mxu0 %v698_v6 }
 0x508   :  { %v775_v11 = vpop.f32.mrf.mxu0 }
 0x509   :  { %v776_v13 = vadd.f32 %v1372_v12, %v775_v11 }
 0x50b   :  { %v780_v16 = vadd.f32 %v776_v13, %v612_v52 }
 0x510   :  { %v777_v14 = vpop.f32.mrf.mxu0 }
 0x511   :  { %v778_v15 = vadd.f32 %v1372_v12, %v777_v14 }
 0x513   :  { %v781_v17 = vadd.f32 %v778_v15, %v613_v53 }
 0x515   :  { %v782_v18 = vpack.c.bf16 %v781_v17, %v780_v16 }
 0x517   :  { %859 = vmatmul.bf16.vlgmr.msra.gmra.mxu1 %v782_v18 }
 0x594   :  { %v860_v22 = vpop.f32.mrf.mxu1 }
 0x595   :  { %v861_v23 = vadd.f32 %v1373_v21, %v860_v22 }
 0x597   :  { %927 = vrot.lane.b32.xlu2 %v861_v23, %s1443_s6  ;;  %v868_v24 = vsel %vm867_vm1, %v861_v23, -inf }
 0x598   :  { %869 = vmax.xlane.f32.xlu0 %v868_v24 }
 0x59c   :  { %v862_v25 = vpop.f32.mrf.mxu1 }
 0x59d   :  { %v863_v26 = vadd.f32 %v1373_v21, %v862_v25 }
 0x59f   :  { %v871_v27 = vsel %vm867_vm1, %v863_v26, -inf }
 0x5a0   :  { %872 = vmax.xlane.f32.xlu0 %v871_v27 }
 0x5b4   :  { %929 = vrot.lane.b32.xlu0 %v863_v26, %s1443_s6 }
 0x5f1   :  { %v928_v40 = vpop.permute.xlu2 %927 }
 0x60b   :  { %v870_v29 = vpop.xlane.xlu0 %869 }
 0x60c   :  { %vm874_vm2 = vcmp.eq.f32.partialorder %v861_v23, %v870_v29 }
 0x60d   :  { %v878_v30 = vsel %vm874_vm2, %v877_v28, 16 }
 0x60e   :  { %v880_v31 = vsel %vm867_vm1, %v878_v30, 2147483647 }
 0x60f   :  { %v882_v32 = vshra.s32 %v880_v31, 16  ;;  %v881_v39 = vand.u32 65535, %v880_v31 }
 0x611   :  { %v884_v33 = vcvt.s32.f32 %v882_v32  ;;  %v883_v42 = vcvt.s32.f32 %v881_v39 }
 0x613   :  { %885 = vmin.xlane.f32.xlu1 %v884_v33  ;;  %v873_v34 = vpop.xlane.xlu0 %872 }
 0x614   :  { %vm875_vm3 = vcmp.eq.f32.partialorder %v863_v26, %v873_v34 }
 0x615   :  { %v879_v35 = vsel %vm875_vm3, %v877_v28, 16 }
 0x616   :  { %v895_v36 = vsel %vm867_vm1, %v879_v35, 2147483647 }
 0x617   :  { %v897_v37 = vshra.s32 %v895_v36, 16  ;;  %v896_v44 = vand.u32 65535, %v895_v36 }
 0x619   :  { %v899_v38 = vcvt.s32.f32 %v897_v37  ;;  %v898_v46 = vcvt.s32.f32 %v896_v44 }
 0x61b   :  { %900 = vmin.xlane.f32.xlu2 %v899_v38 }
 0x626   :  { %v930_v49 = vpop.permute.xlu0 %929 }
 0x686   :  { %v886_v41 = vpop.xlane.xlu1 %885 }
 0x687   :  { %vm887_vm4 = vcmp.eq.f32.partialorder %v884_v33, %v886_v41  ;;  %v892_v48 = vcvt.f32.s32 %v886_v41 }
 0x688   :  { %v888_v43 = vsel %vm887_vm4, %v883_v42, inf }
 0x689   :  { %889 = vmin.xlane.f32.xlu2 %v888_v43  ;;  %v893_v51 = vshll.u32 %v892_v48, 16 }
 0x68e   :  { %v901_v45 = vpop.xlane.xlu2 %900 }
 0x68f   :  { %vm902_vm5 = vcmp.eq.f32.partialorder %v899_v38, %v901_v45  ;;  %v907_v54 = vcvt.f32.s32 %v901_v45 }
 0x690   :  { %v903_v47 = vsel %vm902_vm5, %v898_v46, inf }
 0x691   :  { %904 = vmin.xlane.f32.xlu0 %v903_v47  ;;  %v908_v61 = vshll.u32 %v907_v54, 16 }
 0x6a1   :  { %945 = vrot.lane.b32.xlu2 %v861_v23, %s1444_s8 }
 0x6a5   :  { %947 = vrot.lane.b32.xlu0 %v863_v26, %s1444_s8 }
 0x6fc   :  { %v890_v50 = vpop.xlane.xlu2 %889 }
 0x6fd   :  { %v891_v52 = vcvt.f32.s32 %v890_v50 }
 0x6ff   :  { %v894_v53 = vadd.s32 %v893_v51, %v891_v52 }
 0x701   :  { %vm910_vm7 = vcmp.eq.s32.totalorder %v1561_v20, %v894_v53 }
 0x702   :  { %v912_v55 = vsel %vm910_vm7, %v861_v23, 0.0  ;;  %v933_v56 = vsel %vm910_vm7, %v928_v40, 0.0 }
 0x703   :  { %v915_v57 = vsel %vm914_vm6, %v912_v55, 0.0  ;;  %v935_v58 = vsel %vm914_vm6, %v933_v56, 0.0 }
 0x704   :  { %916 = vadd.xlane.f32.xlu2 %v915_v57  ;;  %v946_v59 = vpop.permute.xlu2 %945  ;;  %936 = vadd.xlane.f32.xlu0 %v935_v58  ;;  %v905_v60 = vpop.xlane.xlu0 %904 }
 0x705   :  { %v951_v62 = vsel %vm910_vm7, %v946_v59, 0.0  ;;  %v906_v63 = vcvt.f32.s32 %v905_v60 }
 0x706   :  { %v953_v0 = vsel %vm914_vm6, %v951_v62, 0.0 }
 0x707   :  { %v909_v1 = vadd.s32 %v908_v61, %v906_v63  ;;  %954 = vadd.xlane.f32.xlu1 %v953_v0 }
 0x709   :  { %vm911_vm8 = vcmp.eq.s32.totalorder %v1561_v20, %v909_v1 }
 0x70a   :  { %v913_v2 = vsel %vm911_vm8, %v863_v26, 0.0  ;;  %v934_v4 = vsel %vm911_vm8, %v930_v49, 0.0 }
 0x70b   :  { %v918_v3 = vsel %vm914_vm6, %v913_v2, 0.0  ;;  %v938_v5 = vsel %vm914_vm6, %v934_v4, 0.0 }
 0x70f   :  { %919 = vadd.xlane.f32.xlu1 %v918_v3 }
 0x717   :  { %939 = vadd.xlane.f32.xlu1 %v938_v5  ;;  %v948_v6 = vpop.permute.xlu0 %947 }
 0x718   :  { %v952_v7 = vsel %vm911_vm8, %v948_v6, 0.0 }
 0x719   :  { %v956_v8 = vsel %vm914_vm6, %v952_v7, 0.0 }
 0x71f   :  { %957 = vadd.xlane.f32.xlu1 %v956_v8 }
 0x777   :  { %v917_v9 = vpop.xlane.xlu2 %916  ;;  %v937_v10 = vpop.xlane.xlu0 %936 }
 0x778   :  { %1374 = vtanh.f32 %v917_v9 }
 0x779   :  { %1376 = vtanh.f32 %v937_v10 }
 0x77a   :  { %v955_v11 = vpop.xlane.xlu1 %954 }
 0x77b   :  { %1378 = vtanh.f32 %v955_v11 }
 0x77e   :  { %v1375_v12 = vpop.eup %1374 }
 0x77f   :  { %v1377_v13 = vpop.eup %1376  ;;  %v923_v14 = vmul.f32 6.0, %v1375_v12 }
 0x780   :  { %v943_v15 = vmul.f32 6.0, %v1377_v13 }
 0x781   :  { %v1379_v16 = vpop.eup %1378 }
 0x782   :  { %v961_v17 = vmul.f32 3.1415927, %v1379_v16  ;;  %v920_v18 = vpop.xlane.xlu1 %919  ;;  %v964_v19 = vsel %vm963_vm9, %v923_v14, %v943_v15 }
 0x784   :  { %v967_v20 = vsel %vm966_vm10, %v964_v19, %v961_v17 }
 0x785   :  { %v970_v21 = vsel %vm969_vm11, %v967_v20, 0.0 }
 0x786   :  { %973 = vst.msk [vmem:[%s1602_s9] sm:$0xff] %vm972_vm12, %v970_v21 }
 0x78a   :  { %v940_v22 = vpop.xlane.xlu1 %939 }
 0x78b   :  { %1380 = vtanh.f32 %v940_v22 }
 0x78c   :  { %1382 = vtanh.f32 %v920_v18 }
 0x791   :  { %v1381_v24 = vpop.eup %1380 }
 0x792   :  { %v958_v23 = vpop.xlane.xlu1 %957  ;;  %v1383_v25 = vpop.eup %1382  ;;  %v944_v26 = vmul.f32 6.0, %v1381_v24 }
 0x793   :  { %1384 = vtanh.f32 %v958_v23  ;;  %v924_v28 = vmul.f32 6.0, %v1383_v25 }
 0x795   :  { %v965_v30 = vsel %vm963_vm9, %v924_v28, %v944_v26 }
 0x799   :  { %v1385_v27 = vpop.eup %1384 }
 0x79a   :  { %v962_v29 = vmul.f32 3.1415927, %v1385_v27 }
 0x79c   :  { %v968_v31 = vsel %vm966_vm10, %v965_v30, %v962_v29 }
 0x79d   :  { %v971_v32 = vsel %vm969_vm11, %v968_v31, 0.0 }
 0x79e   :  { %974 = vst.msk [vmem:[%s1602_s9 + $0x8] sm:$0xff] %vm972_vm12, %v971_v32 }
 0x79f   :  { %979 = vsyncpa [#allocation3], 1 }
 0x7a0   :  { %980 = vsyncpa [#allocation5], 1 }

</bundles_post_ra>
